<compile_context>
chip_gen: v7x
topology: tpu7x:2x2x1
jax: 0.10.0
libtpu: 0.0.40
codegen_flags: <defaults>
</compile_context>

<pallas_src>
import jax
import jax.numpy as jnp
import numpy as np
from jax.experimental import pallas as pl
from jax.experimental.pallas import tpu as pltpu

# ---- module hyper-parameters (from LinearCRFEncoder.__init__) ----
INSIZE = 32
N_BASE = 4
STATE_LEN = 2
SCALE = 5.0
BLANK_SCORE = 2.0
EXPAND_BLANKS = True
EXTRA_LINEAR = True
# blank_score is not None -> size = n_base ** (state_len + 1)
SIZE = N_BASE ** (STATE_LEN + 1)            # 64
EXP_SIZE = (SIZE // N_BASE) * (N_BASE + 1)  # 80 (after blank expansion)


def _round_up(n, m):
    return ((n + m - 1) // m) * m


def crf_encoder_kernel(x_ref, w_ref, b_ref, o_ref):
    # x_ref: (tm, insize); w_ref: (insize, 80); b_ref: (1, 80); o_ref: (tm, 80)
    # Single fused affine (extra_linear + dropout(p=0) + linear), then
    # tanh * scale, then blank lanes overwritten with BLANK_SCORE.
    s = jnp.dot(x_ref[...], w_ref[...],
                preferred_element_type=jnp.float32) + b_ref[...]
    s = jnp.tanh(s) * SCALE
    col = jax.lax.broadcasted_iota(jnp.int32, s.shape, 1)
    s = jnp.where(col % (N_BASE + 1) == 0, jnp.float32(BLANK_SCORE), s)
    o_ref[...] = s.astype(o_ref.dtype)


def linear_crf_encoder(x, w_ext, b_ext, w, b, *, tm=1024):
    """x: (T, N, insize) float32 -> scores: (T, N, 80) (blank-expanded)."""
    T, N, c_in = x.shape
    size = w.shape[0]                       # 64
    exp_size = (size // N_BASE) * (N_BASE + 1)
    M = T * N

    # --- algebraic fusion of the two linears (exact: dropout p=0, no act
    #     between extra_linear and linear) ---
    w_fused = w_ext.T @ w.T                 # (insize, size)
    b_fused = b_ext @ w.T + b               # (size,)

    # --- fold blank expansion into the weight/bias layout: zero columns
    #     where the blank slot goes (kernel overwrites them) ---
    w_exp = jnp.pad(
        w_fused.reshape(c_in, size // N_BASE, N_BASE),
        ((0, 0), (0, 0), (1, 0))).reshape(c_in, exp_size)
    b_exp = jnp.pad(
        b_fused.reshape(size // N_BASE, N_BASE),
        ((0, 0), (1, 0))).reshape(1, exp_size)

    # --- row tiling: clamp tm to the (padded) problem size, pad M so the
    #     grid divides evenly (padded rows are sliced off afterwards) ---
    x2 = x.reshape(M, c_in)
    tm_eff = min(tm, _round_up(M, 8))
    M_pad = _round_up(M, tm_eff)
    if M_pad != M:
        x2 = jnp.pad(x2, ((0, M_pad - M), (0, 0)))

    out = pl.pallas_call(
        crf_encoder_kernel,
        out_shape=jax.ShapeDtypeStruct((M_pad, exp_size), x.dtype),
        grid_spec=pltpu.PrefetchScalarGridSpec(
            num_scalar_prefetch=0,
            grid=(M_pad // tm_eff,),
            in_specs=[
                pl.BlockSpec((tm_eff, c_in), lambda i: (i, 0)),
                pl.BlockSpec((c_in, exp_size), lambda i: (0, 0)),
                pl.BlockSpec((1, exp_size), lambda i: (0, 0)),
            ],
            out_specs=pl.BlockSpec((tm_eff, exp_size), lambda i: (i, 0)),
        ),
        compiler_params=pltpu.CompilerParams(
            dimension_semantics=("parallel",)),
    )(x2, w_exp, b_exp)

    scores = out[:M].reshape(T, N, exp_size)
    # TODO(synk): optional bf16 I/O for v6e/v7x (halves HBM bytes); kept f32
    # here so the correctness check against the f32 reference stays tight.
    return scores


def reference(x, w_ext, b_ext, w, b):
    h = x @ w_ext.T + b_ext
    s = h @ w.T + b
    s = jnp.tanh(s) * SCALE
    T, N, C = s.shape
    s4 = s.reshape(T, N, C // N_BASE, N_BASE)
    s4 = jnp.pad(s4, ((0, 0), (0, 0), (0, 0), (1, 0)),
                 constant_values=BLANK_SCORE)
    return s4.reshape(T, N, -1)


if __name__ == "__main__":
    T, N = 8, 2
    key = jax.random.PRNGKey(0)
    k_x, k_we, k_be, k_w, k_b = jax.random.split(key, 5)

    x = jax.random.normal(k_x, (T, N, INSIZE), dtype=jnp.float32)
    # Deterministic synthetic parameters (shapes match nn.Linear in __init__).
    w_ext = jax.random.normal(k_we, (INSIZE, INSIZE), dtype=jnp.float32) * 0.1
    b_ext = jax.random.normal(k_be, (INSIZE,), dtype=jnp.float32) * 0.1
    w = jax.random.normal(k_w, (SIZE, INSIZE), dtype=jnp.float32) * 0.1
    b = jax.random.normal(k_b, (SIZE,), dtype=jnp.float32) * 0.1

    out = linear_crf_encoder(x, w_ext, b_ext, w, b)
    out = jax.block_until_ready(out)

    ref = jax.block_until_ready(reference(x, w_ext, b_ext, w, b))
    assert out.shape == (T, N, EXP_SIZE), out.shape
    # Slightly looser tolerance: fused single matmul rounds differently from
    # the two-matmul reference (exact up to fp32 rounding).
    np.testing.assert_allclose(np.asarray(out), np.asarray(ref),
                               rtol=1e-4, atol=1e-4)
    print("KERNEL_OK")
</pallas_src>

<mosaic_0001>
module attributes {stable_mosaic.version = 11 : i64} {
  func.func @crf_encoder_kernel(%arg0: i32, %arg1: memref<16x32xf32, #tpu.memory_space<vmem>>, %arg2: memref<32x80xf32, #tpu.memory_space<vmem>>, %arg3: memref<1x80xf32, #tpu.memory_space<vmem>>, %arg4: memref<16x80xf32, #tpu.memory_space<vmem>>) attributes {dimension_semantics = [#tpu.dimension_semantics<parallel>], iteration_bounds = array<i64: 1>, scalar_prefetch = 0 : i64, scratch_operands = 0 : i64, tpu.core_type = #tpu.core_type<tc>, window_params = [{transform_indices = @transform_0, window_bounds = array<i64: 16, 32>}, {pipeline_mode = #tpu.pipeline_mode<synchronous>, transform_indices = @transform_1, window_bounds = array<i64: 32, 80>}, {pipeline_mode = #tpu.pipeline_mode<synchronous>, transform_indices = @transform_2, window_bounds = array<i64: 1, 80>}, {transform_indices = @transform_3, window_bounds = array<i64: 16, 80>}]} {
    %c0 = arith.constant 0 : index
    %c0_0 = arith.constant 0 : index
    %0 = vector.load %arg1[%c0, %c0_0] : memref<16x32xf32, #tpu.memory_space<vmem>>, vector<16x32xf32>
    %c0_1 = arith.constant 0 : index
    %c0_2 = arith.constant 0 : index
    %1 = vector.load %arg2[%c0_1, %c0_2] : memref<32x80xf32, #tpu.memory_space<vmem>>, vector<32x80xf32>
    %cst = arith.constant dense<0.000000e+00> : vector<16x80xf32>
    %2 = tpu.matmul %0, %1, %cst {dimension_numbers = #tpu.dot_dimension_numbers<[1], [0], [0], [1], [0, 0, 1, 1], [], []>} : vector<16x32xf32>, vector<32x80xf32>, vector<16x80xf32> -> vector<16x80xf32>
    %c0_3 = arith.constant 0 : index
    %c0_4 = arith.constant 0 : index
    %3 = vector.load %arg3[%c0_3, %c0_4] : memref<1x80xf32, #tpu.memory_space<vmem>>, vector<1x80xf32>
    %4 = vector.broadcast %3 : vector<1x80xf32> to vector<16x80xf32>
    %5 = arith.addf %2, %4 : vector<16x80xf32>
    %6 = math.tanh %5 : vector<16x80xf32>
    %cst_5 = arith.constant 5.000000e+00 : f32
    %7 = vector.broadcast %cst_5 : f32 to vector<16x80xf32>
    %8 = arith.mulf %6, %7 : vector<16x80xf32>
    %9 = tpu.iota {dimensions = array<i32: 1>} : vector<16x80xi32>
    %c5_i32 = arith.constant 5 : i32
    %c0_i32 = arith.constant 0 : i32
    %10 = arith.cmpi eq, %c5_i32, %c0_i32 : i32
    %c1_i32 = arith.constant 1 : i32
    %11 = arith.select %10, %c1_i32, %c5_i32 : i32
    %12 = vector.broadcast %11 : i32 to vector<16x80xi32>
    %13 = arith.remsi %9, %12 : vector<16x80xi32>
    %c0_i32_6 = arith.constant 0 : i32
    %14 = vector.broadcast %c0_i32_6 : i32 to vector<16x80xi32>
    %15 = arith.cmpi ne, %13, %14 : vector<16x80xi32>
    %c0_i32_7 = arith.constant 0 : i32
    %16 = vector.broadcast %c0_i32_7 : i32 to vector<16x80xi32>
    %17 = arith.cmpi slt, %13, %16 : vector<16x80xi32>
    %c0_i32_8 = arith.constant 0 : i32
    %18 = arith.cmpi slt, %11, %c0_i32_8 : i32
    %19 = vector.broadcast %18 : i1 to vector<16x80xi1>
    %20 = vector.broadcast %19 : vector<16x80xi1> to vector<16x80xi1>
    %21 = arith.xori %17, %20 : vector<16x80xi1>
    %22 = arith.andi %21, %15 : vector<16x80xi1>
    %23 = vector.broadcast %11 : i32 to vector<16x80xi32>
    %24 = arith.addi %13, %23 : vector<16x80xi32>
    %25 = arith.select %22, %24, %13 : vector<16x80xi1>, vector<16x80xi32>
    %c0_i32_9 = arith.constant 0 : i32
    %26 = vector.broadcast %c0_i32_9 : i32 to vector<16x80xi32>
    %27 = arith.cmpi eq, %25, %26 : vector<16x80xi32>
    %cst_10 = arith.constant 2.000000e+00 : f32
    %28 = vector.broadcast %cst_10 : f32 to vector<16x80xf32>
    %29 = arith.select %27, %28, %8 : vector<16x80xi1>, vector<16x80xf32>
    %c0_11 = arith.constant 0 : index
    %c0_12 = arith.constant 0 : index
    %30 = vector.load %arg4[%c0_11, %c0_12] : memref<16x80xf32, #tpu.memory_space<vmem>>, vector<16x80xf32>
    tpu.vector_store %arg4[%c0_11, %c0_12], %29 {strides = array<i32>} : memref<16x80xf32, #tpu.memory_space<vmem>>, vector<16x80xf32>,
    return
  }
  func.func @transform_0(%arg0: i32) -> (i32, i32) {
    %c0_i32 = arith.constant 0 : i32
    %c0_i32_0 = arith.constant 0 : i32
    return %arg0, %c0_i32 : i32, i32
  }
  func.func @transform_1(%arg0: i32) -> (i32, i32) {
    %c0_i32 = arith.constant 0 : i32
    %c0_i32_0 = arith.constant 0 : i32
    %c0_i32_1 = arith.constant 0 : i32
    return %c0_i32, %c0_i32_0 : i32, i32
  }
  func.func @transform_2(%arg0: i32) -> (i32, i32) {
    %c0_i32 = arith.constant 0 : i32
    %c0_i32_0 = arith.constant 0 : i32
    %c0_i32_1 = arith.constant 0 : i32
    return %c0_i32, %c0_i32_0 : i32, i32
  }
  func.func @transform_3(%arg0: i32) -> (i32, i32) {
    %c0_i32 = arith.constant 0 : i32
    %c0_i32_0 = arith.constant 0 : i32
    return %arg0, %c0_i32 : i32, i32
  }
}

</mosaic_0001>

<bundles_post_ra>
// kernel: tpu_custom_call.1
= control target key start
LH: loop header
LB: loop body
LE: loop exit
PB: predicated region body
PF: predicated region fallthrough
CT: control target
= control target key end

     0   :  { %8 = vsyncpa [#allocation3], 0  ;;  %s372_s0 = inlined_call_operand.hbm [shape: f32[16,32], index: 0, kind: input, shape index: {}]   ;;  %s373_s1 = inlined_call_operand.hbm [shape: f32[32,80], index: 1, kind: input, shape index: {}]   ;;  %s374_s2 = inlined_call_operand.vmem [shape: f32[1,80], index: 2, kind: input, shape index: {}]   ;;  %s375_s3 = inlined_call_operand.hbm [shape: f32[16,80], index: 3, kind: output, shape index: {}]  }
   0x1   :  { %9 = vsyncpa [#allocation6], 0 }
   0x2   :  { %10 = vsyncpa [#allocation4], 0  ;;  %s295_s12 = smov [#allocation2]   ;;  %s223_s16 = scalar_lea.hbm %s372_s0, 256 }
   0x3   :  { %s16_s13 = sshll.u32 %s295_s12, 4  ;;  %p224_p0 = scmp.ne.s32.totalorder %s372_s0, %s223_s16  ;;  %s17_s13 = int_to_ptr.vmem [resolvable:$true] %s16_s13 }
   0x4   :  { %p227_p1 = scmp.lt.u32.totalorder %s223_s16, %s372_s0 }
   0x6   :  { %p229_p2 = pnand %p227_p1, %p224_p0 }
   0x8   :  { %232 = shalt.err (!%p229_p2)
}
   0x9   :  { %s233_s21 = scalar_lea.vmem %s17_s13, 256  ;;  %p238_p4 = scmp.lt.s32.totalorder %s17_s13, %s17_s13 }
   0xa   :  { %p234_p3 = scmp.ne.s32.totalorder %s17_s13, %s233_s21  ;;  %p239_p5 = scmp.lt.s32.totalorder %s233_s21, %s233_s21 }
   0xc   :  { %p240_p6 = por %p239_p5, %p238_p4 }
   0xe   :  { %p241_p7 = pnand %p240_p6, %p234_p3 }
  0x10   :  { %244 = shalt.err (!%p241_p7)
}
  0x11   :  { %s296_s22 = smov 128   ;;  %s297_s23 = smov 8  }
  0x12   :  { %22 = dma.hbm_to_vmem [thread:$0]  %s372_s0, 256, %s17_s13, [#allocation3], %s296_s22, %s296_s22, %s297_s23  }
  0x13   :  { %s298_s26 = smov [#allocation5]   ;;  %s245_s30 = scalar_lea.hbm %s373_s1, 512 }
  0x14   :  { %s28_s27 = sshll.u32 %s298_s26, 4  ;;  %p246_p8 = scmp.ne.s32.totalorder %s373_s1, %s245_s30  ;;  %s29_s27 = int_to_ptr.vmem [resolvable:$true] %s28_s27 }
  0x15   :  { %p249_p9 = scmp.lt.u32.totalorder %s245_s30, %s373_s1 }
  0x17   :  { %p251_p10 = pnand %p249_p9, %p246_p8 }
  0x19   :  { %254 = shalt.err (!%p251_p10)
}
  0x1a   :  { %s255_s8 = scalar_lea.vmem %s29_s27, 512  ;;  %p260_p12 = scmp.lt.s32.totalorder %s29_s27, %s29_s27 }
  0x1b   :  { %p256_p11 = scmp.ne.s32.totalorder %s29_s27, %s255_s8  ;;  %p261_p13 = scmp.lt.s32.totalorder %s255_s8, %s255_s8 }
  0x1d   :  { %p262_p0 = por %p261_p13, %p260_p12 }
  0x1f   :  { %p263_p1 = pnand %p262_p0, %p256_p11 }
  0x21   :  { %266 = shalt.err (!%p263_p1)
}
  0x22   :  { %34 = dma.hbm_to_vmem [thread:$0]  %s373_s1, 512, %s29_s27, [#allocation6], %s296_s22, %s296_s22, %s297_s23  }
  0x23   :  { %289 = dma.done.wait [#allocation3], 256  }
  0x24   :  { %290 = vsyncadd [#allocation3], 4294967040 }
  0x25   :  { %291 = dma.done.wait [#allocation6], 512  }
  0x26   :  { %292 = vsyncadd [#allocation6], 4294966784  ;;  %vm56_vm0 = vcmask 261120   ;;  %v45_v0 = vld [vmem:[#allocation5] sm:$0xff]  ;;  %v46_v1 = vld [vmem:[#allocation5 + $0x8] sm:$0xff]  ;;  %v142_v8 = vlaneseq  ;;  %s299_s11 = smov [#allocation7]  }
  0x27   :  { %v47_v2 = vld [vmem:[#allocation5 + $0x10] sm:$0xff]  ;;  %v204_v3 = vpack.c.bf16 %v46_v1, %v45_v0  ;;  %v48_v4 = vld [vmem:[#allocation5 + $0x18] sm:$0xff]  ;;  %s171_s12 = sshll.u32 %s299_s11, 4  ;;  %vm163_vm5 = vcmask 654336   ;;  %s172_s12 = int_to_ptr.vmem [resolvable:$true] %s171_s12 }
  0x28   :  { %v43_v5 = vld [vmem:[#allocation2] sm:$0xff]  ;;  %v208_v6 = vpack.c.bf16 %v48_v4, %v47_v2  ;;  %v44_v7 = vld [vmem:[#allocation2 + $0x8] sm:$0xff]  ;;  %v143_v9 = vand.u32 127, %v142_v8  ;;  %p272_p3 = scmp.lt.s32.totalorder %s172_s12, %s172_s12 }
  0x29   :  { %201 = vmatprep.mubr.msk.f32.mxu0 %vm56_vm0, %v43_v5  ;;  %205 = vmatprep.subr.bf16.mxu0 %v204_v3  ;;  %v184_v14 = vld [vmem:[%s374_s2] ss:$0 sm:$0xff]  ;;  %s267_s2 = scalar_lea.vmem %s172_s12, 256 }
  0x2a   :  { %207 = vmatpush3.bf16.msra.mxu0 %v204_v3  ;;  %v350_v10 = vmul.u32.u64.low 3435973837, %v143_v9  ;;  %v351_v11 = vmul.u32.u64.high 3435973837, %v143_v9, %v350_v10  ;;  %p268_p2 = scmp.ne.s32.totalorder %s172_s12, %s267_s2  ;;  %p273_p4 = scmp.lt.s32.totalorder %s267_s2, %s267_s2 }
  0x2b   :  { %209 = vmatprep.subr.bf16.mxu0 %v208_v6 }
  0x2c   :  { %v150_v12 = vshrl.u32 %v351_v11, 2  ;;  %p274_p5 = por %p273_p4, %p272_p3 }
  0x2e   :  { %211 = vmatpush3.bf16.msra.mxu0 %v208_v6  ;;  %v151_v13 = vmul.u32 5, %v150_v12  ;;  %p275_p6 = pnand %p274_p5, %p268_p2 }
  0x30   :  { %v152_v16 = vsub.s32 %v143_v9, %v151_v13 }
  0x31   :  { %202 = vmatmul.mubr.msk.f32.vlgmr.msra.gmra.mrb[0].mxu0 %vm56_vm0, %v44_v7 }
  0x32   :  { %vm155_vm1 = vcmp.ne.s32.totalorder %v152_v16, 0  ;;  %vm156_vm2 = vcmp.lt.s32.totalorder %v152_v16, 0  ;;  %v158_v20 = vadd.s32 5, %v152_v16 }
  0x33   :  { %vm157_vm3 = vmand %vm156_vm2, %vm155_vm1 }
  0x34   :  { %v159_v21 = vsel %vm157_vm3, %v158_v20, %v152_v16 }
  0x35   :  { %vm160_vm4 = vcmp.eq.s32.totalorder %v159_v21, 0 }
 0x104   :  { %v203_v15 = vpop.f32.mrb[0].mxu0 }
 0x105   :  { %v135_v17 = vadd.f32 %v203_v15, %v184_v14  ;;  %v129_v18 = vpop.f32.mrb[1].mxu0 }
 0x106   :  { %v130_v19 = vadd.f32 %v184_v14, %v129_v18 }
 0x107   :  { %219 = vtanh.f32 %v135_v17 }
 0x108   :  { %221 = vtanh.f32 %v130_v19 }
 0x111   :  { %v220_v22 = vpop.eup %219 }
 0x112   :  { %v222_v23 = vpop.eup %221  ;;  %v141_v24 = vmul.f32 5.0, %v220_v22 }
 0x113   :  { %v140_v25 = vmul.f32 5.0, %v222_v23 }
 0x114   :  { %v162_v26 = vsel %vm160_vm4, 2.0, %v141_v24 }
 0x115   :  { %v161_v27 = vsel %vm160_vm4, 2.0, %v140_v25  ;;  %165 = vst.msk [vmem:[#allocation7 + $0x8] sm:$0xff] %vm163_vm5, %v162_v26 }
 0x116   :  { %164 = vst.msk [vmem:[#allocation7] sm:$0xff] %vm163_vm5, %v161_v27 }
 0x117   :  { %278 = shalt.err (!%p275_p6)
}
 0x118   :  { %s279_s15 = scalar_lea.hbm %s375_s3, 256 }
 0x119   :  { %p280_p7 = scmp.ne.s32.totalorder %s375_s3, %s279_s15  ;;  %p283_p8 = scmp.lt.u32.totalorder %s279_s15, %s375_s3 }
 0x11b   :  { %p285_p9 = pnand %p283_p8, %p280_p7 }
 0x11d   :  { %288 = shalt.err (!%p285_p9)
}
 0x11e   :  { %177 = dma.vmem_to_hbm [thread:$0]  %s172_s12, 256, %s375_s3, [#allocation4], %s296_s22, %s296_s22, %s297_s23  }
 0x11f   :  { %293 = dma.done.wait [#allocation4], 256  }
 0x120   :  { %294 = vsyncadd [#allocation4], 4294967040 }
 0x121   :  { %181 = vsyncpa [#allocation3], 1 }
 0x122   :  { %182 = vsyncpa [#allocation6], 1 }
 0x123   :  { %183 = vsyncpa [#allocation4], 1 }

</bundles_post_ra>
